<compile_context>
chip_gen: v7x
topology: tpu7x:2x2x1
jax: 0.10.0
libtpu: 0.0.40
codegen_flags: <defaults>
</compile_context>

<pallas_src>
import jax
import jax.numpy as jnp
from jax import lax
from jax.experimental import pallas as pl
from jax.experimental.pallas import tpu as pltpu


def _round_up(x, m):
    return (x + m - 1) // m * m


def hypemb_kernel(x_ref, w_ref, b_ref, o_ref):
    """relu(x @ W + b) with the batch laid out lane-dense, computed on the VPU.

    x_ref : (F_IN, TR, C)   VMEM (f32 or bf16); element (k, r, c) = feature k
                            of flattened batch row r*C + c.
    w_ref : (F_IN, F_OUT)   f32 SMEM, (in, out) layout  (y = x @ W).
    b_ref : (F_OUT,)        f32 SMEM.
    o_ref : (F_OUT, TR, C)  VMEM.
    """
    f_in, tr, c = x_ref.shape
    f_out = o_ref.shape[0]

    # SMEM scalars read exactly once per kernel invocation (hoisted out of the
    # chunk loops; the fori_loop body below is traced once, so nothing is
    # re-emitted per chunk).
    w = [[w_ref[k, j] for j in range(f_out)] for k in range(f_in)]
    b = [b_ref[j] for j in range(f_out)]

    # Sublane strip: 8 rows for 4-byte dtypes, 16 rows (one packed vreg) for
    # 2-byte dtypes when the tile height allows it.
    itemsize = jnp.dtype(x_ref.dtype).itemsize
    r_chunk = 16 if (itemsize == 2 and tr % 16 == 0) else 8
    assert tr % r_chunk == 0
    # Lane strip bounds the live set: f_in slices + 1 accumulator (all widened
    # to f32) stay <= ~32 vregs, well inside the 64-vreg file.
    lane_chunk = min(c, 4096 // r_chunk)

    def r_body(i, carry):
        r = pl.multiple_of(i * r_chunk, r_chunk)
        for c0 in range(0, c, lane_chunk):
            width = min(lane_chunk, c - c0)           # multiple of 128 by construction
            # Each activation slice is loaded exactly ONCE per (r, c0) chunk
            # (5 vld per chunk instead of 25).
            xs = [
                x_ref[k, pl.ds(r, r_chunk), c0:c0 + width].astype(jnp.float32)
                for k in range(f_in)
            ]
            for j in range(f_out):
                acc = xs[0] * w[0][j]
                for k in range(1, f_in):
                    acc = acc + xs[k] * w[k][j]
                o_ref[j, pl.ds(r, r_chunk), c0:c0 + width] = jnp.maximum(
                    acc + b[j], 0.0
                ).astype(o_ref.dtype)
        return carry

    lax.fori_loop(0, tr // r_chunk, r_body, 0)


def hypemb_lane_dense(x3, weight_io, bias, *, sublane_tile=256, out_dtype=None):
    """Fast path: activations already in the lane-dense layout.

    x3        : (F_IN, Rp, C) with C % 128 == 0 and Rp % 8 == 0.
    weight_io : (F_IN, F_OUT)  ((in, out) layout: y = x @ W).
    bias      : (F_OUT,)
    Returns (F_OUT, Rp, C).  No layout plumbing — callers that keep this layout
    persistent pay only the unavoidable 1x read + 1x write of HBM traffic.
    """
    F_in, Rp, C = x3.shape
    F_out = weight_io.shape[1]
    assert C % 128 == 0 and Rp % 8 == 0
    assert sublane_tile >= 8 and sublane_tile % 8 == 0

    # Largest multiple-of-8 tile <= sublane_tile that divides Rp.
    TR = min(sublane_tile, Rp)
    while Rp % TR:
        TR -= 8

    # Default block (5, 256, 1024) f32 = 5 MiB; in + out, double-buffered =
    # 20 MiB -> inside the 32 MiB scoped-VMEM default on v5e/v6e/v7x.  Raising
    # TR beyond 256 (e.g. on v6e) requires vmem_limit_bytes; not done here so
    # the same defaults are safe on v7x (64 MiB physical VMEM).
    out_dtype = x3.dtype if out_dtype is None else out_dtype
    return pl.pallas_call(
        hypemb_kernel,
        out_shape=jax.ShapeDtypeStruct((F_out, Rp, C), out_dtype),
        grid_spec=pl.GridSpec(
            grid=(Rp // TR,),
            in_specs=[
                pl.BlockSpec((F_in, TR, C), lambda i: (0, i, 0)),        # activations
                pl.BlockSpec(memory_space=pltpu.MemorySpace.SMEM),       # weight (5,5)
                pl.BlockSpec(memory_space=pltpu.MemorySpace.SMEM),       # bias (5,)
            ],
            out_specs=pl.BlockSpec((F_out, TR, C), lambda i: (0, i, 0)),
        ),
        compiler_params=pltpu.CompilerParams(
            dimension_semantics=("parallel",),
        ),
    )(x3, weight_io.astype(jnp.float32), bias.astype(jnp.float32))


def hypemb_forward(hps, weight, bias, *, lane_tile=1024, sublane_tile=256,
                   min_pallas_batch=4096):
    """HypEmb forward: relu(hps @ weight.T + bias).

    hps    : (B, 5) float
    weight : (F_OUT, F_IN)  — PyTorch nn.Linear layout (x @ W.T).
    bias   : (F_OUT,)

    Small batches (the production case: one 5-d hyperparameter row per graph)
    are launch-bound, so they stay in plain jnp and XLA fuses the dot+relu.
    Large batches pack once into the lane-dense layout and run the Pallas
    kernel.  NOTE: the pack/unpack transposes add ~2 extra HBM passes on this
    strictly memory-bound op; callers that can keep the (F, Rp, C) layout
    persistent should use `hypemb_lane_dense` directly.
    """
    assert lane_tile % 128 == 0 and sublane_tile % 8 == 0
    B, F_in = hps.shape
    F_out = weight.shape[0]
    w_io = jnp.transpose(weight)                   # (in, out); 5x5, negligible

    if B < min_pallas_batch:
        return jnp.maximum(hps @ w_io + bias, 0.0)

    # Lane-dense packing: (B, F) -> (F, B) -> pad -> (F, Rp, C).
    C = min(lane_tile, _round_up(B, 128))          # lane width (multiple of 128)
    R = pl.cdiv(B, C)                              # rows of C batch elements
    TR = min(sublane_tile, _round_up(R, 8))        # sublane tile (multiple of 8)
    Rp = _round_up(R, TR)
    Bp = Rp * C

    xT = jnp.transpose(hps)
    if Bp != B:
        # Padded lanes compute relu(bias) (garbage) and are sliced away below.
        xT = jnp.pad(xT, ((0, 0), (0, Bp - B)))
    x3 = xT.reshape(F_in, Rp, C)

    y3 = hypemb_lane_dense(x3, w_io, bias, sublane_tile=TR)
    return jnp.transpose(y3.reshape(F_out, Bp)[:, :B])   # (B, F_OUT)


def init_params(key, in_features=5, out_features=5):
    # PyTorch nn.Linear default init, weight stored in (out, in) layout.
    kw, kb = jax.random.split(key)
    bound = (1.0 / in_features) ** 0.5
    weight = jax.random.uniform(
        kw, (out_features, in_features), jnp.float32, -bound, bound
    )
    bias = jax.random.uniform(kb, (out_features,), jnp.float32, -bound, bound)
    return weight, bias


if __name__ == "__main__":
    key = jax.random.PRNGKey(0)
    k_x1, k_x2, k_x3, k_p = jax.random.split(key, 4)

    weight, bias = init_params(k_p)     # PyTorch layout: (out, in)
    w_io = jnp.transpose(weight)        # (in, out)

    def ref_fn(x):
        return jnp.maximum(x @ w_io + bias, 0.0)

    # 1) Production-sized batch (one 5-d hp row per graph): jnp dispatch path.
    batch = 8
    hps = jax.random.normal(k_x1, (batch, 5), dtype=jnp.float32)
    out = jax.block_until_ready(hypemb_forward(hps, weight, bias))
    assert out.shape == (batch, 5)
    assert jnp.allclose(out, ref_fn(hps), atol=1e-5, rtol=1e-5), "mismatch (B=8 jnp path)"

    # 2) Ragged batch forced through the Pallas path with small tiles:
    #    exercises multi-step grid + batch padding.
    batch2 = 2067
    hps2 = jax.random.normal(k_x2, (batch2, 5), dtype=jnp.float32)
    out2 = jax.block_until_ready(
        hypemb_forward(hps2, weight, bias,
                       lane_tile=128, sublane_tile=8, min_pallas_batch=0)
    )
    assert out2.shape == (batch2, 5)
    assert jnp.allclose(out2, ref_fn(hps2), atol=1e-5, rtol=1e-5), "mismatch (B=2067, small tiles)"

    # 3) Same batch with default tiles (single grid step, lane-strip path).
    out2b = jax.block_until_ready(
        hypemb_forward(hps2, weight, bias, min_pallas_batch=0)
    )
    assert jnp.allclose(out2b, ref_fn(hps2), atol=1e-5, rtol=1e-5), "mismatch (B=2067, default tiles)"

    # 4) Lane-dense fast path used directly (no pack/unpack plumbing).
    x3 = jax.random.normal(k_x3, (5, 16, 256), dtype=jnp.float32)
    y3 = jax.block_until_ready(hypemb_lane_dense(x3, w_io, bias))
    ref3 = jnp.maximum(
        jnp.einsum("krc,ko->orc", x3, w_io) + bias[:, None, None], 0.0
    )
    assert y3.shape == (5, 16, 256)
    assert jnp.allclose(y3, ref3, atol=1e-5, rtol=1e-5), "mismatch (lane-dense path)"

    print("KERNEL_OK")
</pallas_src>

<mosaic_0001>
module attributes {stable_mosaic.version = 11 : i64} {
  func.func @hypemb_kernel(%arg0: i32, %arg1: memref<5x8x128xf32, #tpu.memory_space<vmem>>, %arg2: memref<5x5xf32, #tpu.memory_space<smem>>, %arg3: memref<5xf32, #tpu.memory_space<smem>>, %arg4: memref<5x8x128xf32, #tpu.memory_space<vmem>>) attributes {dimension_semantics = [#tpu.dimension_semantics<parallel>], iteration_bounds = array<i64: 3>, scalar_prefetch = 0 : i64, scratch_operands = 0 : i64, tpu.core_type = #tpu.core_type<tc>, window_params = [{transform_indices = @transform_0, window_bounds = array<i64: 5, 8, 128>}, {transform_indices = @transform_1, window_bounds = array<i64: 5, 5>}, {transform_indices = @transform_2, window_bounds = array<i64: 5>}, {transform_indices = @transform_3, window_bounds = array<i64: 5, 8, 128>}]} {
    %c0 = arith.constant 0 : index
    %c0_0 = arith.constant 0 : index
    %0 = memref.load %arg2[%c0, %c0_0] : memref<5x5xf32, #tpu.memory_space<smem>>
    %c0_1 = arith.constant 0 : index
    %c1 = arith.constant 1 : index
    %1 = memref.load %arg2[%c0_1, %c1] : memref<5x5xf32, #tpu.memory_space<smem>>
    %c0_2 = arith.constant 0 : index
    %c2 = arith.constant 2 : index
    %2 = memref.load %arg2[%c0_2, %c2] : memref<5x5xf32, #tpu.memory_space<smem>>
    %c0_3 = arith.constant 0 : index
    %c3 = arith.constant 3 : index
    %3 = memref.load %arg2[%c0_3, %c3] : memref<5x5xf32, #tpu.memory_space<smem>>
    %c0_4 = arith.constant 0 : index
    %c4 = arith.constant 4 : index
    %4 = memref.load %arg2[%c0_4, %c4] : memref<5x5xf32, #tpu.memory_space<smem>>
    %c1_5 = arith.constant 1 : index
    %c0_6 = arith.constant 0 : index
    %5 = memref.load %arg2[%c1_5, %c0_6] : memref<5x5xf32, #tpu.memory_space<smem>>
    %c1_7 = arith.constant 1 : index
    %c1_8 = arith.constant 1 : index
    %6 = memref.load %arg2[%c1_7, %c1_8] : memref<5x5xf32, #tpu.memory_space<smem>>
    %c1_9 = arith.constant 1 : index
    %c2_10 = arith.constant 2 : index
    %7 = memref.load %arg2[%c1_9, %c2_10] : memref<5x5xf32, #tpu.memory_space<smem>>
    %c1_11 = arith.constant 1 : index
    %c3_12 = arith.constant 3 : index
    %8 = memref.load %arg2[%c1_11, %c3_12] : memref<5x5xf32, #tpu.memory_space<smem>>
    %c1_13 = arith.constant 1 : index
    %c4_14 = arith.constant 4 : index
    %9 = memref.load %arg2[%c1_13, %c4_14] : memref<5x5xf32, #tpu.memory_space<smem>>
    %c2_15 = arith.constant 2 : index
    %c0_16 = arith.constant 0 : index
    %10 = memref.load %arg2[%c2_15, %c0_16] : memref<5x5xf32, #tpu.memory_space<smem>>
    %c2_17 = arith.constant 2 : index
    %c1_18 = arith.constant 1 : index
    %11 = memref.load %arg2[%c2_17, %c1_18] : memref<5x5xf32, #tpu.memory_space<smem>>
    %c2_19 = arith.constant 2 : index
    %c2_20 = arith.constant 2 : index
    %12 = memref.load %arg2[%c2_19, %c2_20] : memref<5x5xf32, #tpu.memory_space<smem>>
    %c2_21 = arith.constant 2 : index
    %c3_22 = arith.constant 3 : index
    %13 = memref.load %arg2[%c2_21, %c3_22] : memref<5x5xf32, #tpu.memory_space<smem>>
    %c2_23 = arith.constant 2 : index
    %c4_24 = arith.constant 4 : index
    %14 = memref.load %arg2[%c2_23, %c4_24] : memref<5x5xf32, #tpu.memory_space<smem>>
    %c3_25 = arith.constant 3 : index
    %c0_26 = arith.constant 0 : index
    %15 = memref.load %arg2[%c3_25, %c0_26] : memref<5x5xf32, #tpu.memory_space<smem>>
    %c3_27 = arith.constant 3 : index
    %c1_28 = arith.constant 1 : index
    %16 = memref.load %arg2[%c3_27, %c1_28] : memref<5x5xf32, #tpu.memory_space<smem>>
    %c3_29 = arith.constant 3 : index
    %c2_30 = arith.constant 2 : index
    %17 = memref.load %arg2[%c3_29, %c2_30] : memref<5x5xf32, #tpu.memory_space<smem>>
    %c3_31 = arith.constant 3 : index
    %c3_32 = arith.constant 3 : index
    %18 = memref.load %arg2[%c3_31, %c3_32] : memref<5x5xf32, #tpu.memory_space<smem>>
    %c3_33 = arith.constant 3 : index
    %c4_34 = arith.constant 4 : index
    %19 = memref.load %arg2[%c3_33, %c4_34] : memref<5x5xf32, #tpu.memory_space<smem>>
    %c4_35 = arith.constant 4 : index
    %c0_36 = arith.constant 0 : index
    %20 = memref.load %arg2[%c4_35, %c0_36] : memref<5x5xf32, #tpu.memory_space<smem>>
    %c4_37 = arith.constant 4 : index
    %c1_38 = arith.constant 1 : index
    %21 = memref.load %arg2[%c4_37, %c1_38] : memref<5x5xf32, #tpu.memory_space<smem>>
    %c4_39 = arith.constant 4 : index
    %c2_40 = arith.constant 2 : index
    %22 = memref.load %arg2[%c4_39, %c2_40] : memref<5x5xf32, #tpu.memory_space<smem>>
    %c4_41 = arith.constant 4 : index
    %c3_42 = arith.constant 3 : index
    %23 = memref.load %arg2[%c4_41, %c3_42] : memref<5x5xf32, #tpu.memory_space<smem>>
    %c4_43 = arith.constant 4 : index
    %c4_44 = arith.constant 4 : index
    %24 = memref.load %arg2[%c4_43, %c4_44] : memref<5x5xf32, #tpu.memory_space<smem>>
    %c0_45 = arith.constant 0 : index
    %25 = memref.load %arg3[%c0_45] : memref<5xf32, #tpu.memory_space<smem>>
    %c1_46 = arith.constant 1 : index
    %26 = memref.load %arg3[%c1_46] : memref<5xf32, #tpu.memory_space<smem>>
    %c2_47 = arith.constant 2 : index
    %27 = memref.load %arg3[%c2_47] : memref<5xf32, #tpu.memory_space<smem>>
    %c3_48 = arith.constant 3 : index
    %28 = memref.load %arg3[%c3_48] : memref<5xf32, #tpu.memory_space<smem>>
    %c4_49 = arith.constant 4 : index
    %29 = memref.load %arg3[%c4_49] : memref<5xf32, #tpu.memory_space<smem>>
    %c0_i32 = arith.constant 0 : i32
    %c8_i32 = arith.constant 8 : i32
    %30 = arith.muli %c0_i32, %c8_i32 : i32
    %31 = tpu.assume_multiple %30, 8 : i32
    %c0_50 = arith.constant 0 : index
    %32 = arith.index_cast %31 : i32 to index
    %c0_51 = arith.constant 0 : index
    %33 = vector.load %arg1[%c0_50, %32, %c0_51] : memref<5x8x128xf32, #tpu.memory_space<vmem>>, vector<1x8x128xf32>
    %34 = vector.shape_cast %33 : vector<1x8x128xf32> to vector<8x128xf32>
    %c1_52 = arith.constant 1 : index
    %35 = arith.index_cast %31 : i32 to index
    %c0_53 = arith.constant 0 : index
    %36 = vector.load %arg1[%c1_52, %35, %c0_53] : memref<5x8x128xf32, #tpu.memory_space<vmem>>, vector<1x8x128xf32>
    %37 = vector.shape_cast %36 : vector<1x8x128xf32> to vector<8x128xf32>
    %c2_54 = arith.constant 2 : index
    %38 = arith.index_cast %31 : i32 to index
    %c0_55 = arith.constant 0 : index
    %39 = vector.load %arg1[%c2_54, %38, %c0_55] : memref<5x8x128xf32, #tpu.memory_space<vmem>>, vector<1x8x128xf32>
    %40 = vector.shape_cast %39 : vector<1x8x128xf32> to vector<8x128xf32>
    %c3_56 = arith.constant 3 : index
    %41 = arith.index_cast %31 : i32 to index
    %c0_57 = arith.constant 0 : index
    %42 = vector.load %arg1[%c3_56, %41, %c0_57] : memref<5x8x128xf32, #tpu.memory_space<vmem>>, vector<1x8x128xf32>
    %43 = vector.shape_cast %42 : vector<1x8x128xf32> to vector<8x128xf32>
    %c4_58 = arith.constant 4 : index
    %44 = arith.index_cast %31 : i32 to index
    %c0_59 = arith.constant 0 : index
    %45 = vector.load %arg1[%c4_58, %44, %c0_59] : memref<5x8x128xf32, #tpu.memory_space<vmem>>, vector<1x8x128xf32>
    %46 = vector.shape_cast %45 : vector<1x8x128xf32> to vector<8x128xf32>
    %47 = vector.broadcast %0 : f32 to vector<8x128xf32>
    %48 = arith.mulf %34, %47 : vector<8x128xf32>
    %49 = vector.broadcast %5 : f32 to vector<8x128xf32>
    %50 = arith.mulf %37, %49 : vector<8x128xf32>
    %51 = arith.addf %48, %50 : vector<8x128xf32>
    %52 = vector.broadcast %10 : f32 to vector<8x128xf32>
    %53 = arith.mulf %40, %52 : vector<8x128xf32>
    %54 = arith.addf %51, %53 : vector<8x128xf32>
    %55 = vector.broadcast %15 : f32 to vector<8x128xf32>
    %56 = arith.mulf %43, %55 : vector<8x128xf32>
    %57 = arith.addf %54, %56 : vector<8x128xf32>
    %58 = vector.broadcast %20 : f32 to vector<8x128xf32>
    %59 = arith.mulf %46, %58 : vector<8x128xf32>
    %60 = arith.addf %57, %59 : vector<8x128xf32>
    %61 = vector.broadcast %25 : f32 to vector<8x128xf32>
    %62 = arith.addf %60, %61 : vector<8x128xf32>
    %cst = arith.constant 0.000000e+00 : f32
    %63 = vector.broadcast %cst : f32 to vector<8x128xf32>
    %64 = arith.maximumf %62, %63 : vector<8x128xf32>
    %c0_60 = arith.constant 0 : index
    %65 = arith.index_cast %31 : i32 to index
    %c0_61 = arith.constant 0 : index
    %66 = vector.load %arg4[%c0_60, %65, %c0_61] : memref<5x8x128xf32, #tpu.memory_space<vmem>>, vector<1x8x128xf32>
    %67 = vector.shape_cast %66 : vector<1x8x128xf32> to vector<8x128xf32>
    %68 = vector.shape_cast %64 : vector<8x128xf32> to vector<1x8x128xf32>
    tpu.vector_store %arg4[%c0_60, %65, %c0_61], %68 {strides = array<i32>} : memref<5x8x128xf32, #tpu.memory_space<vmem>>, vector<1x8x128xf32>,
    %69 = vector.broadcast %1 : f32 to vector<8x128xf32>
    %70 = arith.mulf %34, %69 : vector<8x128xf32>
    %71 = vector.broadcast %6 : f32 to vector<8x128xf32>
    %72 = arith.mulf %37, %71 : vector<8x128xf32>
    %73 = arith.addf %70, %72 : vector<8x128xf32>
    %74 = vector.broadcast %11 : f32 to vector<8x128xf32>
    %75 = arith.mulf %40, %74 : vector<8x128xf32>
    %76 = arith.addf %73, %75 : vector<8x128xf32>
    %77 = vector.broadcast %16 : f32 to vector<8x128xf32>
    %78 = arith.mulf %43, %77 : vector<8x128xf32>
    %79 = arith.addf %76, %78 : vector<8x128xf32>
    %80 = vector.broadcast %21 : f32 to vector<8x128xf32>
    %81 = arith.mulf %46, %80 : vector<8x128xf32>
    %82 = arith.addf %79, %81 : vector<8x128xf32>
    %83 = vector.broadcast %26 : f32 to vector<8x128xf32>
    %84 = arith.addf %82, %83 : vector<8x128xf32>
    %cst_62 = arith.constant 0.000000e+00 : f32
    %85 = vector.broadcast %cst_62 : f32 to vector<8x128xf32>
    %86 = arith.maximumf %84, %85 : vector<8x128xf32>
    %c1_63 = arith.constant 1 : index
    %87 = arith.index_cast %31 : i32 to index
    %c0_64 = arith.constant 0 : index
    %88 = vector.load %arg4[%c1_63, %87, %c0_64] : memref<5x8x128xf32, #tpu.memory_space<vmem>>, vector<1x8x128xf32>
    %89 = vector.shape_cast %88 : vector<1x8x128xf32> to vector<8x128xf32>
    %90 = vector.shape_cast %86 : vector<8x128xf32> to vector<1x8x128xf32>
    tpu.vector_store %arg4[%c1_63, %87, %c0_64], %90 {strides = array<i32>} : memref<5x8x128xf32, #tpu.memory_space<vmem>>, vector<1x8x128xf32>,
    %91 = vector.broadcast %2 : f32 to vector<8x128xf32>
    %92 = arith.mulf %34, %91 : vector<8x128xf32>
    %93 = vector.broadcast %7 : f32 to vector<8x128xf32>
    %94 = arith.mulf %37, %93 : vector<8x128xf32>
    %95 = arith.addf %92, %94 : vector<8x128xf32>
    %96 = vector.broadcast %12 : f32 to vector<8x128xf32>
    %97 = arith.mulf %40, %96 : vector<8x128xf32>
    %98 = arith.addf %95, %97 : vector<8x128xf32>
    %99 = vector.broadcast %17 : f32 to vector<8x128xf32>
    %100 = arith.mulf %43, %99 : vector<8x128xf32>
    %101 = arith.addf %98, %100 : vector<8x128xf32>
    %102 = vector.broadcast %22 : f32 to vector<8x128xf32>
    %103 = arith.mulf %46, %102 : vector<8x128xf32>
    %104 = arith.addf %101, %103 : vector<8x128xf32>
    %105 = vector.broadcast %27 : f32 to vector<8x128xf32>
    %106 = arith.addf %104, %105 : vector<8x128xf32>
    %cst_65 = arith.constant 0.000000e+00 : f32
    %107 = vector.broadcast %cst_65 : f32 to vector<8x128xf32>
    %108 = arith.maximumf %106, %107 : vector<8x128xf32>
    %c2_66 = arith.constant 2 : index
    %109 = arith.index_cast %31 : i32 to index
    %c0_67 = arith.constant 0 : index
    %110 = vector.load %arg4[%c2_66, %109, %c0_67] : memref<5x8x128xf32, #tpu.memory_space<vmem>>, vector<1x8x128xf32>
    %111 = vector.shape_cast %110 : vector<1x8x128xf32> to vector<8x128xf32>
    %112 = vector.shape_cast %108 : vector<8x128xf32> to vector<1x8x128xf32>
    tpu.vector_store %arg4[%c2_66, %109, %c0_67], %112 {strides = array<i32>} : memref<5x8x128xf32, #tpu.memory_space<vmem>>, vector<1x8x128xf32>,
    %113 = vector.broadcast %3 : f32 to vector<8x128xf32>
    %114 = arith.mulf %34, %113 : vector<8x128xf32>
    %115 = vector.broadcast %8 : f32 to vector<8x128xf32>
    %116 = arith.mulf %37, %115 : vector<8x128xf32>
    %117 = arith.addf %114, %116 : vector<8x128xf32>
    %118 = vector.broadcast %13 : f32 to vector<8x128xf32>
    %119 = arith.mulf %40, %118 : vector<8x128xf32>
    %120 = arith.addf %117, %119 : vector<8x128xf32>
    %121 = vector.broadcast %18 : f32 to vector<8x128xf32>
    %122 = arith.mulf %43, %121 : vector<8x128xf32>
    %123 = arith.addf %120, %122 : vector<8x128xf32>
    %124 = vector.broadcast %23 : f32 to vector<8x128xf32>
    %125 = arith.mulf %46, %124 : vector<8x128xf32>
    %126 = arith.addf %123, %125 : vector<8x128xf32>
    %127 = vector.broadcast %28 : f32 to vector<8x128xf32>
    %128 = arith.addf %126, %127 : vector<8x128xf32>
    %cst_68 = arith.constant 0.000000e+00 : f32
    %129 = vector.broadcast %cst_68 : f32 to vector<8x128xf32>
    %130 = arith.maximumf %128, %129 : vector<8x128xf32>
    %c3_69 = arith.constant 3 : index
    %131 = arith.index_cast %31 : i32 to index
    %c0_70 = arith.constant 0 : index
    %132 = vector.load %arg4[%c3_69, %131, %c0_70] : memref<5x8x128xf32, #tpu.memory_space<vmem>>, vector<1x8x128xf32>
    %133 = vector.shape_cast %132 : vector<1x8x128xf32> to vector<8x128xf32>
    %134 = vector.shape_cast %130 : vector<8x128xf32> to vector<1x8x128xf32>
    tpu.vector_store %arg4[%c3_69, %131, %c0_70], %134 {strides = array<i32>} : memref<5x8x128xf32, #tpu.memory_space<vmem>>, vector<1x8x128xf32>,
    %135 = vector.broadcast %4 : f32 to vector<8x128xf32>
    %136 = arith.mulf %34, %135 : vector<8x128xf32>
    %137 = vector.broadcast %9 : f32 to vector<8x128xf32>
    %138 = arith.mulf %37, %137 : vector<8x128xf32>
    %139 = arith.addf %136, %138 : vector<8x128xf32>
    %140 = vector.broadcast %14 : f32 to vector<8x128xf32>
    %141 = arith.mulf %40, %140 : vector<8x128xf32>
    %142 = arith.addf %139, %141 : vector<8x128xf32>
    %143 = vector.broadcast %19 : f32 to vector<8x128xf32>
    %144 = arith.mulf %43, %143 : vector<8x128xf32>
    %145 = arith.addf %142, %144 : vector<8x128xf32>
    %146 = vector.broadcast %24 : f32 to vector<8x128xf32>
    %147 = arith.mulf %46, %146 : vector<8x128xf32>
    %148 = arith.addf %145, %147 : vector<8x128xf32>
    %149 = vector.broadcast %29 : f32 to vector<8x128xf32>
    %150 = arith.addf %148, %149 : vector<8x128xf32>
    %cst_71 = arith.constant 0.000000e+00 : f32
    %151 = vector.broadcast %cst_71 : f32 to vector<8x128xf32>
    %152 = arith.maximumf %150, %151 : vector<8x128xf32>
    %c4_72 = arith.constant 4 : index
    %153 = arith.index_cast %31 : i32 to index
    %c0_73 = arith.constant 0 : index
    %154 = vector.load %arg4[%c4_72, %153, %c0_73] : memref<5x8x128xf32, #tpu.memory_space<vmem>>, vector<1x8x128xf32>
    %155 = vector.shape_cast %154 : vector<1x8x128xf32> to vector<8x128xf32>
    %156 = vector.shape_cast %152 : vector<8x128xf32> to vector<1x8x128xf32>
    tpu.vector_store %arg4[%c4_72, %153, %c0_73], %156 {strides = array<i32>} : memref<5x8x128xf32, #tpu.memory_space<vmem>>, vector<1x8x128xf32>,
    %c1_i32 = arith.constant 1 : i32
    return
  }
  func.func @transform_0(%arg0: i32) -> (i32, i32, i32) {
    %c0_i32 = arith.constant 0 : i32
    %c0_i32_0 = arith.constant 0 : i32
    %c0_i32_1 = arith.constant 0 : i32
    return %c0_i32, %arg0, %c0_i32_0 : i32, i32, i32
  }
  func.func @transform_1(%arg0: i32) -> (i32, i32) {
    %c0_i32 = arith.constant 0 : i32
    %c0_i32_0 = arith.constant 0 : i32
    %c0_i32_1 = arith.constant 0 : i32
    return %c0_i32, %c0_i32_0 : i32, i32
  }
  func.func @transform_2(%arg0: i32) -> i32 {
    %c0_i32 = arith.constant 0 : i32
    %c0_i32_0 = arith.constant 0 : i32
    return %c0_i32 : i32
  }
  func.func @transform_3(%arg0: i32) -> (i32, i32, i32) {
    %c0_i32 = arith.constant 0 : i32
    %c0_i32_0 = arith.constant 0 : i32
    %c0_i32_1 = arith.constant 0 : i32
    return %c0_i32, %arg0, %c0_i32_0 : i32, i32, i32
  }
}

</mosaic_0001>

<bundles_post_ra>
// kernel: tpu_custom_call.1
= control target key start
LH: loop header
LB: loop body
LE: loop exit
PB: predicated region body
PF: predicated region fallthrough
CT: control target
= control target key end

     0   :  { %8 = vsyncpa [#allocation3], 0  ;;  %s1079_s0 = inlined_call_operand.hbm [shape: f32[5,24,128], index: 0, kind: input, shape index: {}]   ;;  %s1080_s1 = inlined_call_operand.hbm [shape: f32[5,5], index: 1, kind: input, shape index: {}]   ;;  %s1081_s2 = inlined_call_operand.vmem [shape: f32[5], index: 2, kind: input, shape index: {}]   ;;  %s1082_s3 = inlined_call_operand.hbm [shape: f32[5,24,128], index: 3, kind: output, shape index: {}]  }
   0x1   :  { %10 = vsyncpa [#allocation3 + $0x1], 0 }
   0x2   :  { %11 = vsyncpa [#allocation5], 0 }
   0x3   :  { %12 = vsyncpa [#allocation6], 0 }
   0x4   :  { %13 = vsyncpa [#allocation4], 0 }
   0x5   :  { %15 = vsyncpa [#allocation4 + $0x1], 0  ;;  %s755_s12 = smov 0   ;;  %s757_s13 = smov 0  }
   0x6   :  { %s759_s14 = smov 0   ;;  %s761_s15 = smov 0  }
   0x7 LB: > { %s776_s16 = sadd.s32 4294967295, %s723_s15   ;;  %s468_s17 = sadd.s32 4294967294, %s723_s15   ;;  %s723_s15 = sphi %s761_s15, %s1103_s15   ;;  %s719_s14 = sphi %s759_s14, %s1102_s14   ;;  %s715_s13 = sphi %s757_s13, %s1101_s13   ;;  %s711_s12 = sphi %s755_s12, %s1100_s12  }
   0x8   : > { %s780_s18 = sadd.s32 1, %s723_s15   ;;  %s28_s19 = sadd.s32 1, %s719_s14 }
   0x9   : > { %s25_s20 = ssub.s32 %s723_s15, %s780_s18  ;;  %p35_p0 = scmp.ne.s32.totalorder %s719_s14, %s715_s13 }
   0xa   : > { %p26_p1 = scmp.eq.s32.totalorder %s25_s20, 0  ;;  %p36_p2 = scmp.eq.s32.totalorder %s723_s15, 0 }
   0xb   : > { %p41_p3 = scmp.ne.s32.totalorder %s715_s13, %s711_s12  ;;  %p1083_p4 = scmp.eq.s32.totalorder %s776_s16, 0 }
   0xc   : > { %s792_s21 = scalar_select %p26_p1, %s719_s14, %s28_s19  }
   0xd   : > { %p794_p5 = por %p36_p2, %p35_p0  ;;  %p800_p6 = por %p1083_p4, %p41_p3 }
   0xe   : > { %p107_p7 = scmp.eq.s32.totalorder %s776_s16, 2  ;;  %p113_p8 = scmp.eq.s32.totalorder %s468_s17, 2 }
   0xf   : > { %s1087_s23 = scalar_select %p800_p6, 1, 0 }
  0x10   : > { %p469_p9 = scmp.ge.s32.totalorder %s723_s15, 1  ;;  %p120_p10 = scmp.lt.s32.totalorder %s723_s15, 4 }
  0x11   : > { %p807_p11 = por %p107_p7, %p35_p0  ;;  %p811_p12 = por %p113_p8, %p41_p3 }
  0x12   : > { %p815_p13 = pnand %p469_p9, %p120_p10  ;;  %p547_p2 = scmp.lt.s32.totalorder %s723_s15, 3 }
  0x13   : > { %s1088_s24 = scalar_select %p807_p11, 1, 0 }
  0x14   : > { %s1089_s25 = scalar_select %p811_p12, 1, 0 }
  0x15   : > { %p530_p1 = pneg %p815_p13  ;;  %s142_s29 = sshll.u32 %s1081_s2, 4  ;;  %s143_s29 = int_to_ptr.vmem [resolvable:$true] %s142_s29 }
  0x16   : > { %p833_p3 = pnand %p547_p2, %p794_p5  ;;  %s153_s5 = sand.u32 1, %s719_s14  }
  0x17   : > { %p827_p0 = pnand %p530_p1, %p1083_p4  ;;  %s591_s8 = scalar_lea.hbm %s1080_s1, 128 }
  0x18   : > { %p592_p7 = scmp.ne.s32.totalorder %s1080_s1, %s591_s8  ;;  %p598_p5 = scmp.lt.u32.totalorder %s591_s8, %s1080_s1 }
  0x19   : > { %p593_p8 = pneg %p827_p0 }
  0x1b   : > { %p594_p9 = pnand %p593_p8, %p592_p7 }
  0x1d   : > { %p595_p10 = pneg %p594_p9 }
  0x1f   : > { %p600_p1 = pnand %p598_p5, %p595_p10 }
  0x21   : > { %603 = shalt.err (!%p600_p1)
}
  0x22   : > { %s725_s19 = smov [#allocation7]   ;;  %s604_s27 = scalar_lea.vmem %s143_s29, 16 }
  0x23   : > { %533 = dma.hbm_to_smem (!%p827_p0), %s1080_s1, 128, %s725_s19, [#allocation5]  }
  0x24   : > { %p605_p2 = scmp.ne.s32.totalorder %s143_s29, %s604_s27  ;;  %p612_p11 = scmp.lt.s32.totalorder %s143_s29, %s143_s29 }
  0x25   : > { %p613_p7 = scmp.lt.s32.totalorder %s604_s27, %s604_s27 }
  0x26   : > { %p607_p4 = pnand %p605_p2, %p593_p8 }
  0x27   : > { %p614_p9 = por %p613_p7, %p612_p11 }
  0x28   : > { %p608_p12 = pneg %p607_p4 }
  0x2a   : > { %p615_p6 = pnand %p614_p9, %p608_p12 }
  0x2c   : > { %618 = shalt.err (!%p615_p6)
}
  0x2d   : > { %s726_s28 = smov [#allocation8]   ;;  %s516_s6 = smul.u32 40, %s153_s5 }
  0x2e   : > { %536 = dma.vmem_to_smem (!%p827_p0), %s143_s29, 16, %s726_s28, [#allocation6]  }
  0x2f   : > { %s473_s7 = sshll.u32 %s723_s15, 7  ;;  %s157_s11 = scalar_lea.vmem [#allocation2], %s516_s6 }
  0x30   : > { %s860_s10 = scalar_lea.hbm %s1079_s0, %s473_s7  ;;  %s163_s17 = sshll.u32 %s157_s11, 4  ;;  %s862_s17 = int_to_ptr.vmem [resolvable:$true] %s163_s17 }
  0x31   : > { %s864_s30 = scalar_lea.sflag [#allocation3], %s153_s5  ;;  %s619_s19 = scalar_lea.hbm %s860_s10, 640 }
  0x32   : > { %p620_p4 = scmp.ne.s32.totalorder %s860_s10, %s619_s19  ;;  %p621_p6 = pneg %p833_p3 }
  0x33   : > { %s624_s22 = scalar_lea.hbm %s1079_s0, 1920  ;;  %p625_p0 = scmp.lt.u32.totalorder %s860_s10, %s1079_s0 }
  0x34   : > { %p622_p11 = pnand %p621_p6, %p620_p4  ;;  %p626_p8 = scmp.lt.u32.totalorder %s624_s22, %s619_s19 }
  0x35   : > { %p628_p5 = scmp.lt.u32.totalorder %s619_s19, %s860_s10 }
  0x36   : > { %p623_p12 = pneg %p622_p11  ;;  %p627_p10 = por %p626_p8, %p625_p0 }
  0x38   : > { %p629_p1 = por %p628_p5, %p627_p10 }
  0x3a   : > { %p630_p2 = pnand %p629_p1, %p623_p12 }
  0x3c   : > { %633 = shalt.err (!%p630_p2)
}
  0x3d   : > { %s634_s5 = scalar_lea.vmem %s862_s17, 640  ;;  %s727_s6 = smov [#allocation2]  }
  0x3e   : > { %p635_p7 = scmp.ne.s32.totalorder %s862_s17, %s634_s5  ;;  %s639_s7 = sshll.u32 %s727_s6, 4  ;;  %s640_s7 = int_to_ptr.vmem [resolvable:$false] %s639_s7 }
  0x3f   : > { %s641_s8 = scalar_lea.vmem %s640_s7, 1280  ;;  %p642_p11 = scmp.lt.s32.totalorder %s862_s17, %s640_s7 }
  0x40   : > { %p637_p9 = pnand %p635_p7, %p621_p6  ;;  %p643_p0 = scmp.lt.s32.totalorder %s641_s8, %s634_s5 }
  0x42   : > { %p638_p4 = pneg %p637_p9  ;;  %p644_p8 = por %p643_p0, %p642_p11 }
  0x44   : > { %p645_p10 = pnand %p644_p8, %p638_p4 }
  0x46   : > { %648 = shalt.err (!%p645_p10)
}
  0x47   : > { %s728_s9 = smov 384   ;;  %s729_s11 = smov 128  }
  0x48   : > { %s730_s19 = smov 8   ;;  %175 = sbr.rel (%p815_p13) target bundleno = 142 (0x8e), region = 32 }
  0x49   : > { %540 = dma.hbm_to_vmem [thread:$0]  (!%p833_p3), %s860_s10, 640, %s862_s17, %s864_s30, %s728_s9, %s729_s11, %s730_s19  }
  0x4a   : > { %s895_s29 = sand.u32 (!%p815_p13), 1, %s715_s13   ;;  %p1093_p6 = scmp.ne.s32.totalorder (!%p815_p13), %s1087_s23, 0 }
  0x4b   : > { %s517_s20 = smul.u32 (!%p815_p13), 40, %s895_s29  ;;  %s178_s22 = scalar_lea.sflag (!%p815_p13), [#allocation3], %s895_s29 }
  0x4d   : > { %s181_s27 = scalar_lea.vmem (!%p815_p13), [#allocation2], %s517_s20 }
  0x4f   : > { %694 = dma.done.wait (%p1093_p6), %s178_s22, 640  }
  0x50   : > { %696 = vsyncadd (%p1093_p6), %s178_s22, 4294966656  ;;  %p1094_p3 = scmp.eq.s32.totalorder %s776_s16, 0 }
  0x52   : > { %698 = dma.done.wait (%p1094_p3), [#allocation5], 128   ;;  %p1095_p13 = pmov %p1094_p3 }
  0x53   : > { %p1096_p12 = pmov %p1094_p3 }
  0x54   : > { %700 = vsyncadd (%p1095_p13), [#allocation5], 4294967168 }
  0x55   : > { %702 = dma.done.wait (%p1096_p12), [#allocation6], 16   ;;  %p1097_p5 = pmov %p1094_p3 }
  0x57   : > { %704 = vsyncadd (%p1097_p5), [#allocation6], 4294967280 }
  0x58   : > { %194 = sfence }
  0x59   : > { %s213_s26 = sld [smem:[#allocation7]]  ;;  %v915_v0 = vld [vmem:[%s181_s27] sm:$0xff]  ;;  %s477_s28 = sld [smem:[#allocation7 + $0x1]]  ;;  %v917_v1 = vld [vmem:[%s181_s27 + $0x8] sm:$0xff]  ;;  %v919_v2 = vld [vmem:[%s181_s27 + $0x10] sm:$0xff] }
  0x5a   : > { %s481_s4 = sld [smem:[#allocation7 + $0x80]]  ;;  %s921_s5 = sld [smem:[#allocation7 + $0x81]]  ;;  %v929_v4 = vld [vmem:[%s181_s27 + $0x18] sm:$0xff]  ;;  %v936_v8 = vld [vmem:[%s181_s27 + $0x20] sm:$0xff] }
  0x5b   : > { %s486_s10 = sld [smem:[#allocation7 + $0x100]]  ;;  %s923_s6 = sld [smem:[#allocation7 + $0x101]] }
  0x5c   : > { %s491_s17 = sld [smem:[#allocation7 + $0x180]]  ;;  %s925_s7 = sld [smem:[#allocation7 + $0x181]] }
  0x5d   : > { %s496_s30 = sld [smem:[#allocation7 + $0x200]]  ;;  %s927_s8 = sld [smem:[#allocation7 + $0x201]] }
  0x5e   : > { %s913_s23 = sld [smem:[#allocation8]]  ;;  %s932_s9 = sld [smem:[#allocation8 + $0x1]] }
  0x5f   : > { %v256_v3 = vstv %s213_s26  ;;  %s934_s11 = sld [smem:[#allocation7 + $0x2]]  ;;  %v274_v15 = vstv %s477_s28  ;;  %s949_s27 = sld [smem:[#allocation7 + $0x3]] }
  0x60   : > { %v257_v5 = vmul.f32 %v256_v3, %v915_v0  ;;  %v258_v6 = vstv %s481_s4  ;;  %s940_s19 = sld [smem:[#allocation7 + $0x82]]  ;;  %v275_v17 = vmul.f32 %v274_v15, %v915_v0  ;;  %v276_v18 = vstv %s921_s5  ;;  %s964_s28 = sld [smem:[#allocation7 + $0x203]] }
  0x61   : > { %v261_v7 = vstv %s486_s10  ;;  %v259_v9 = vmul.f32 %v917_v1, %v258_v6  ;;  %s942_s22 = sld [smem:[#allocation7 + $0x102]]  ;;  %v279_v19 = vstv %s923_s6  ;;  %s955_s10 = sld [smem:[#allocation7 + $0x83]]  ;;  %v277_v21 = vmul.f32 %v917_v1, %v276_v18 }
  0x62   : > { %v262_v10 = vmul.f32 %v919_v2, %v261_v7  ;;  %v264_v11 = vstv %s491_s17  ;;  %s944_s26 = sld [smem:[#allocation7 + $0x182]]  ;;  %s957_s17 = sld [smem:[#allocation7 + $0x103]]  ;;  %v280_v22 = vmul.f32 %v919_v2, %v279_v19  ;;  %v282_v23 = vstv %s925_s7 }
  0x63   : > { %v267_v12 = vstv %s496_s30  ;;  %s946_s4 = sld [smem:[#allocation7 + $0x202]]  ;;  %v260_v13 = vadd.f32 %v259_v9, %v257_v5  ;;  %v265_v14 = vmul.f32 %v929_v4, %v264_v11  ;;  %s962_s30 = sld [smem:[#allocation7 + $0x183]]  ;;  %v283_v25 = vmul.f32 %v929_v4, %v282_v23 }
  0x64   : > { %v268_v16 = vmul.f32 %v936_v8, %v267_v12  ;;  %v270_v24 = vstv %s913_s23  ;;  %v285_v26 = vstv %s927_s8  ;;  %s969_s5 = sld [smem:[#allocation8 + $0x2]]  ;;  %v278_v29 = vadd.f32 %v277_v21, %v275_v17  ;;  %s974_s6 = sld [smem:[#allocation7 + $0x4]] }
  0x65   : > { %v263_v20 = vadd.f32 %v262_v10, %v260_v13  ;;  %v293_v27 = vstv %s934_s11  ;;  %v286_v30 = vmul.f32 %v936_v8, %v285_v26  ;;  %s976_s7 = sld [smem:[#allocation7 + $0x84]]  ;;  %v288_v40 = vstv %s932_s9  ;;  %s1008_s9 = scalar_lea.vmem [#allocation9], %s517_s20 }
  0x66   : > { %v294_v31 = vmul.f32 %v293_v27, %v915_v0  ;;  %v295_v32 = vstv %s940_s19  ;;  %s982_s23 = sld [smem:[#allocation7 + $0x104]]  ;;  %v281_v37 = vadd.f32 %v280_v22, %v278_v29  ;;  %v312_v43 = vstv %s949_s27  ;;  %s995_s19 = sld [smem:[#allocation8 + $0x3]] }
  0x67   : > { %v266_v28 = vadd.f32 %v265_v14, %v263_v20  ;;  %v298_v33 = vstv %s942_s22  ;;  %s984_s8 = sld [smem:[#allocation7 + $0x184]]  ;;  %v296_v38 = vmul.f32 %v917_v1, %v295_v32  ;;  %v313_v47 = vmul.f32 %v312_v43, %v915_v0  ;;  %s363_s20 = sshll.u32 %s1008_s9, 4  ;;  %s1029_s20 = int_to_ptr.vmem [resolvable:$true] %s363_s20 }
  0x68   : > { %v301_v34 = vstv %s944_s26  ;;  %v299_v39 = vmul.f32 %v919_v2, %v298_v33  ;;  %s992_s11 = sld [smem:[#allocation7 + $0x204]]  ;;  %v284_v45 = vadd.f32 %v283_v25, %v281_v37  ;;  %v314_v48 = vstv %s955_s10  ;;  %s513_s26 = sshll.u32 %s776_s16, 7 }
  0x69   : > { %v304_v35 = vstv %s946_s4  ;;  %v269_v36 = vadd.f32 %v268_v16, %v266_v28  ;;  %v302_v41 = vmul.f32 %v929_v4, %v301_v34  ;;  %v297_v46 = vadd.f32 %v296_v38, %v294_v31  ;;  %s1012_s22 = sld [smem:[#allocation8 + $0x4]]  ;;  %s1035_s10 = scalar_lea.hbm %s1082_s3, %s513_s26 }
  0x6a   : > { %v305_v42 = vmul.f32 %v936_v8, %v304_v35  ;;  %v317_v49 = vstv %s957_s17  ;;  %v320_v50 = vstv %s962_s30  ;;  %v323_v51 = vstv %s964_s28  ;;  %s351_s17 = scalar_lea.sflag [#allocation4], %s895_s29  ;;  %s649_s30 = scalar_lea.vmem %s1029_s20, 640 }
  0x6b   : > { %v271_v44 = vadd.f32 %v270_v24, %v269_v36  ;;  %v287_v53 = vadd.f32 %v286_v30, %v284_v45  ;;  %v300_v54 = vadd.f32 %v299_v39, %v297_v46  ;;  %v315_v55 = vmul.f32 %v917_v1, %v314_v48  ;;  %p650_p1 = scmp.ne.s32.totalorder %s1029_s20, %s649_s30  ;;  %p1098_p2 = scmp.ne.s32.totalorder %s1088_s24, 0 }
  0x6c   : > { %v307_v56 = vstv %s969_s5  ;;  %v318_v57 = vmul.f32 %v919_v2, %v317_v49  ;;  %v321_v58 = vmul.f32 %v929_v4, %v320_v50  ;;  %v324_v59 = vmul.f32 %v936_v8, %v323_v51  ;;  %s731_s16 = smov [#allocation9]  }
  0x6d   : > { %v272_v52 = vmax.f32 %v271_v44, 0.0  ;;  %v289_v60 = vadd.f32 %v288_v40, %v287_v53  ;;  %v303_v61 = vadd.f32 %v302_v41, %v300_v54  ;;  %v316_v62 = vadd.f32 %v315_v55, %v313_v47  ;;  %p651_p7 = pnand %p650_p1, %p1098_p2  ;;  %s653_s28 = sshll.u32 %s731_s16, 4  ;;  %s654_s28 = int_to_ptr.vmem [resolvable:$false] %s653_s28 }
  0x6e   : > { %v331_v63 = vstv %s974_s6  ;;  %v333_v5 = vstv %s976_s7  ;;  %v336_v6 = vstv %s982_s23  ;;  %v339_v7 = vstv %s984_s8  ;;  %s655_s5 = scalar_lea.vmem %s654_s28, 1280  ;;  %p656_p4 = scmp.lt.s32.totalorder %s1029_s20, %s654_s28 }
  0x6f   : > { %273 = vst [vmem:[%s1008_s9] sm:$0xff] %v272_v52  ;;  %v332_v3 = vmul.f32 %v331_v63, %v915_v0  ;;  %v290_v9 = vmax.f32 %v289_v60, 0.0  ;;  %v306_v10 = vadd.f32 %v305_v42, %v303_v61  ;;  %v319_v11 = vadd.f32 %v318_v57, %v316_v62  ;;  %p652_p9 = pneg %p651_p7  ;;  %p657_p11 = scmp.lt.s32.totalorder %s655_s5, %s649_s30 }
  0x70   : > { %v334_v12 = vmul.f32 %v917_v1, %v333_v5  ;;  %v337_v13 = vmul.f32 %v919_v2, %v336_v6  ;;  %v342_v14 = vstv %s992_s11  ;;  %v340_v0 = vmul.f32 %v929_v4, %v339_v7 }
  0x71   : > { %509 = vst [vmem:[%s1008_s9 + $0x8] sm:$0xff] %v290_v9  ;;  %v308_v15 = vadd.f32 %v307_v56, %v306_v10  ;;  %v322_v16 = vadd.f32 %v321_v58, %v319_v11  ;;  %v326_v18 = vstv %s995_s19  ;;  %v343_v1 = vmul.f32 %v936_v8, %v342_v14  ;;  %p658_p0 = por %p657_p11, %p656_p4 }
  0x72   : > { %v335_v17 = vadd.f32 %v334_v12, %v332_v3  ;;  %v345_v23 = vstv %s1012_s22 }
  0x73   : > { %v309_v19 = vmax.f32 %v308_v15, 0.0  ;;  %v325_v20 = vadd.f32 %v324_v59, %v322_v16  ;;  %p659_p8 = pnand %p658_p0, %p652_p9 }
  0x74   : > { %v338_v21 = vadd.f32 %v337_v13, %v335_v17 }
  0x75   : > { %510 = vst [vmem:[%s1008_s9 + $0x10] sm:$0xff] %v309_v19  ;;  %v327_v2 = vadd.f32 %v326_v18, %v325_v20 }
  0x76   : > { %v341_v22 = vadd.f32 %v340_v0, %v338_v21 }
  0x77   : > { %v328_v24 = vmax.f32 %v327_v2, 0.0 }
  0x78   : > { %v344_v25 = vadd.f32 %v343_v1, %v341_v22 }
  0x79   : > { %511 = vst [vmem:[%s1008_s9 + $0x18] sm:$0xff] %v328_v24 }
  0x7a   : > { %v346_v4 = vadd.f32 %v345_v23, %v344_v25 }
  0x7c   : > { %v347_v8 = vmax.f32 %v346_v4, 0.0 }
  0x7e   : > { %512 = vst [vmem:[%s1008_s9 + $0x20] sm:$0xff] %v347_v8 }
  0x7f   : > { %662 = shalt.err (!%p659_p8)
}
  0x80   : > { %s663_s6 = scalar_lea.hbm %s1035_s10, 640  ;;  %s667_s8 = scalar_lea.hbm %s1082_s3, 1920 }
  0x81   : > { %p664_p10 = scmp.ne.s32.totalorder %s1035_s10, %s663_s6  ;;  %p668_p13 = scmp.lt.u32.totalorder %s1035_s10, %s1082_s3 }
  0x82   : > { %p669_p12 = scmp.lt.u32.totalorder %s667_s8, %s663_s6  ;;  %p671_p1 = scmp.lt.u32.totalorder %s663_s6, %s1035_s10 }
  0x83   : > { %p665_p6 = pnand %p664_p10, %p1098_p2 }
  0x84   : > { %p670_p5 = por %p669_p12, %p668_p13 }
  0x85   : > { %p666_p3 = pneg %p665_p6 }
  0x86   : > { %p672_p7 = por %p671_p1, %p670_p5 }
  0x88   : > { %p673_p9 = pnand %p672_p7, %p666_p3 }
  0x8a   : > { %676 = shalt.err (!%p673_p9)
}
  0x8b   : > { %s732_s9 = smov 128   ;;  %s733_s22 = smov 384  }
  0x8c   : > { %s734_s26 = smov 8  }
  0x8d   : > { %528 = dma.vmem_to_hbm [thread:$0]  (%p1098_p2), %s1029_s20, 640, %s1035_s10, %s351_s17, %s732_s9, %s733_s22, %s734_s26  }
  0x8e PF: > { %p550_p4 = scmp.ge.s32.totalorder %s723_s15, 2  ;;  %s378_s4 = sand.u32 1, %s711_s12  }
  0x8f   : > { %p1099_p11 = scmp.ne.s32.totalorder %s1089_s25, 0  ;;  %s379_s27 = scalar_lea.sflag [#allocation4], %s378_s4 }
  0x91   : > { %p542_p0 = pnand %p550_p4, %p1099_p11 }
  0x93   : > { %706 = dma.done.wait (!%p542_p0), %s379_s27, 640  }
  0x94   : > { %708 = vsyncadd (!%p542_p0), %s379_s27, 4294966656  ;;  %p18_p8 = scmp.ge.s32.totalorder %s780_s18, 5   ;;  %s1100_s12 = smov %s715_s13 }
  0x95   : > { %s1101_s13 = smov %s719_s14  ;;  %s1102_s14 = smov %s792_s21 }
  0x96   : > { %s1103_s15 = smov %s780_s18  ;;  %20 = sbr.rel (!%p18_p8) target bundleno = 7 (0x7), region = 95 }
  0x9d   :  { %384 = vsyncpa [#allocation3], 1 }
  0x9e   :  { %386 = vsyncpa [#allocation3 + $0x1], 1 }
  0x9f   :  { %387 = vsyncpa [#allocation4], 1 }
  0xa0   :  { %389 = vsyncpa [#allocation4 + $0x1], 1 }
  0xa1   :  { %390 = vsyncpa [#allocation5], 1 }
  0xa2   :  { %392 = vsyncpa [#allocation5 + $0x1], 1 }
  0xa3   :  { %393 = vsyncpa [#allocation6], 1 }
  0xa4   :  { %395 = vsyncpa [#allocation6 + $0x1], 1 }

</bundles_post_ra>
